<compile_context>
chip_gen: v7x
topology: tpu7x:2x2x1
jax: 0.10.0
libtpu: 0.0.40
codegen_flags: <defaults>
</compile_context>

<pallas_src>
import jax
import jax.numpy as jnp
from jax.experimental import pallas as pl
from jax.experimental.pallas import tpu as pltpu


def _metanet_decoder_kernel(x_ref, w1_ref, b1_ref, w2_ref, b2_ref, o_ref):
    # x:[TB,E] bf16  w1:[E,M] bf16  b1:[1,M] f32  w2:[M,EEp] bf16  b2:[1,EEp] f32
    # o:[TB,EEp] out_dtype.  Accumulation is f32 on the MXU.
    h = jnp.dot(x_ref[...], w1_ref[...], preferred_element_type=jnp.float32)
    h = jnp.maximum(h + b1_ref[...], 0.0)                     # Linear + ReLU
    y = jnp.dot(h.astype(w2_ref.dtype), w2_ref[...],
                preferred_element_type=jnp.float32)
    o_ref[...] = (y + b2_ref[...]).astype(o_ref.dtype)        # Linear (+bias)


def _pick_batch_tile(block_b, B, E, EEp, M, out_bytes, vmem_budget=16 << 20):
    """Sublane-aligned batch tile that fits a conservative VMEM budget."""
    tb = max(8, (int(block_b) // 8) * 8)          # round caller value to 8
    tb = min(tb, pl.cdiv(B, 8) * 8)               # never bigger than batch
    # Streaming VMEM per batch row: x (bf16, double-buffered) + out
    # (double-buffered). Weights counted double-buffered as the worst case
    # (covers the fallback path if single buffering is unavailable).
    weight_bytes = 2 * ((E * M + M * EEp) * 2 + (M + EEp) * 4)
    per_row = 2 * (E * 2) + 2 * (EEp * out_bytes)
    fit = max(8, ((vmem_budget - weight_bytes) // per_row) // 8 * 8)
    tb = min(tb, fit)
    # v7x megacore: a 1-step grid would leave one TensorCore idle on the
    # "parallel" batch axis; split into >= 2 tiles when possible.
    if B > 8 and pl.cdiv(B, tb) < 2:
        tb = max(8, pl.cdiv(pl.cdiv(B, 2), 8) * 8)
    return tb


def metanet_forward(emb_fea, params, *, block_b=512, out_dtype=jnp.float32):
    """emb_fea: [B, 1, E] float32 -> [B, E*E] == decoder(emb_fea).squeeze(1).

    out_dtype=jnp.float32 matches the PyTorch module; pass jnp.bfloat16 to
    halve the dominant output writeback when downstream tolerates it.
    """
    B, S, E = emb_fea.shape
    assert S == 1, "squeeze(1) in the reference implies seq dim == 1"
    w1, b1, w2, b2 = params["w1"], params["b1"], params["w2"], params["b2"]
    M = w1.shape[1]
    EE = w2.shape[1]

    # squeeze(1) + host-side bf16 cast of the (tiny) input.
    x = emb_fea.reshape(B, E).astype(jnp.bfloat16)

    # Lane-dense output: pad the EE axis to a multiple of 128 so the output
    # store is an unmasked vst (EE=E*E=100 for canonical emb_dim=10 would
    # otherwise force masked partial stores). No-op when EE % 128 == 0.
    EEp = pl.cdiv(EE, 128) * 128
    if EEp != EE:
        w2 = jnp.pad(w2, ((0, 0), (0, EEp - EE)))
        b2 = jnp.pad(b2, ((0, 0), (0, EEp - EE)))

    out_bytes = jnp.dtype(out_dtype).itemsize
    TB = _pick_batch_tile(block_b, B, E, EEp, M, out_bytes)
    grid = (pl.cdiv(B, TB),)   # ragged last tile: OOB output rows are masked

    def run(weight_mode):
        def resident(shape):
            # Constant index map -> weights stay VMEM-resident across the grid.
            if weight_mode is None:
                return pl.BlockSpec(shape, lambda i: (0, 0))
            return pl.BlockSpec(shape, lambda i: (0, 0),
                                pipeline_mode=weight_mode)

        return pl.pallas_call(
            _metanet_decoder_kernel,
            out_shape=jax.ShapeDtypeStruct((B, EEp), out_dtype),
            grid_spec=pltpu.PrefetchScalarGridSpec(
                num_scalar_prefetch=0,
                grid=grid,
                in_specs=[
                    pl.BlockSpec((TB, E), lambda i: (i, 0)),   # x: batch-tiled
                    resident((E, M)),                          # w1
                    resident((1, M)),                          # b1
                    resident((M, EEp)),                        # w2
                    resident((1, EEp)),                        # b2
                ],
                out_specs=pl.BlockSpec((TB, EEp), lambda i: (i, 0)),
            ),
            compiler_params=pltpu.CompilerParams(
                dimension_semantics=("parallel",)),
        )(x, w1, b1, w2, b2)

    try:
        # Single-buffer the resident weights (their block index never changes).
        out = run(pl.Buffered(1))
    except Exception:
        # TODO(synk): drop this fallback once pipeline_mode=pl.Buffered(1) on
        # resident-weight specs is confirmed on the targeted jax/Mosaic version.
        out = run(None)

    return out if EEp == EE else out[:, :EE]


def init_params(key, emb_dim, meta_dim):
    """Deterministic synthetic init (PyTorch-like uniform fan-in scaling).

    Decoder weights stored transposed ([in, out]) in bf16 (MXU-native);
    biases f32. event_K params are created for fidelity but unused by forward.
    """
    ks = jax.random.split(key, 8)

    def lin(kw, kb, fan_in, fan_out, bias=True, w_dtype=jnp.float32):
        bound = 1.0 / jnp.sqrt(fan_in)
        w = jax.random.uniform(kw, (fan_in, fan_out), jnp.float32, -bound, bound)
        w = w.astype(w_dtype)
        b = (jax.random.uniform(kb, (1, fan_out), jnp.float32, -bound, bound)
             if bias else None)
        return w, b

    # decoder: Linear(E, M) -> ReLU -> Linear(M, E*E)
    w1, b1 = lin(ks[0], ks[1], emb_dim, meta_dim, w_dtype=jnp.bfloat16)
    w2, b2 = lin(ks[2], ks[3], meta_dim, emb_dim * emb_dim, w_dtype=jnp.bfloat16)

    # event_K params exist in __init__ but are unused by forward().
    ek_w1, ek_b1 = lin(ks[4], ks[5], emb_dim, emb_dim)
    ek_w2, _ = lin(ks[6], ks[7], emb_dim, 1, bias=False)

    return {"w1": w1, "b1": b1, "w2": w2, "b2": b2,
            "event_k_w1": ek_w1, "event_k_b1": ek_b1, "event_k_w2": ek_w2}


if __name__ == "__main__":
    emb_dim, meta_dim, batch = 16, 32, 40

    key = jax.random.PRNGKey(0)
    kx, kp = jax.random.split(key)
    emb_fea = jax.random.normal(kx, (batch, 1, emb_dim), jnp.float32)
    params = init_params(kp, emb_dim, meta_dim)

    # Pure-JAX reference of the decoder path using identical dtypes/precision.
    x = emb_fea.reshape(batch, emb_dim).astype(jnp.bfloat16)
    h = jnp.dot(x, params["w1"], preferred_element_type=jnp.float32)
    h = jnp.maximum(h + params["b1"], 0.0)
    ref = jnp.dot(h.astype(jnp.bfloat16), params["w2"],
                  preferred_element_type=jnp.float32) + params["b2"]

    # 1) Small tile -> 3-step grid with a ragged (masked) last tile.
    out = jax.block_until_ready(metanet_forward(emb_fea, params, block_b=16))
    assert out.shape == (batch, emb_dim * emb_dim)
    assert out.dtype == jnp.float32
    assert jnp.allclose(out, ref, atol=1e-2, rtol=1e-2)

    # 2) Default tile -> auto-clamped TB, grid split into >= 2 parallel steps.
    out2 = jax.block_until_ready(metanet_forward(emb_fea, params))
    assert jnp.allclose(out2, ref, atol=1e-2, rtol=1e-2)

    # 3) bf16 output path (halves the dominant writeback traffic).
    out_bf16 = jax.block_until_ready(
        metanet_forward(emb_fea, params, out_dtype=jnp.bfloat16))
    assert out_bf16.dtype == jnp.bfloat16
    assert jnp.allclose(out_bf16.astype(jnp.float32), ref, atol=5e-2, rtol=5e-2)

    print("KERNEL_OK")
</pallas_src>

<mosaic_0001>
module attributes {stable_mosaic.version = 11 : i64} {
  func.func @_metanet_decoder_kernel(%arg0: i32, %arg1: memref<16x16xbf16, #tpu.memory_space<vmem>>, %arg2: memref<16x32xbf16, #tpu.memory_space<vmem>>, %arg3: memref<1x32xf32, #tpu.memory_space<vmem>>, %arg4: memref<32x256xbf16, #tpu.memory_space<vmem>>, %arg5: memref<1x256xf32, #tpu.memory_space<vmem>>, %arg6: memref<16x256xf32, #tpu.memory_space<vmem>>) attributes {dimension_semantics = [#tpu.dimension_semantics<parallel>], iteration_bounds = array<i64: 3>, scalar_prefetch = 0 : i64, scratch_operands = 0 : i64, tpu.core_type = #tpu.core_type<tc>, window_params = [{transform_indices = @transform_0, window_bounds = array<i64: 16, 16>}, {pipeline_mode = #tpu.pipeline_mode<synchronous>, transform_indices = @transform_1, window_bounds = array<i64: 16, 32>}, {pipeline_mode = #tpu.pipeline_mode<synchronous>, transform_indices = @transform_2, window_bounds = array<i64: 1, 32>}, {pipeline_mode = #tpu.pipeline_mode<synchronous>, transform_indices = @transform_3, window_bounds = array<i64: 32, 256>}, {pipeline_mode = #tpu.pipeline_mode<synchronous>, transform_indices = @transform_4, window_bounds = array<i64: 1, 256>}, {transform_indices = @transform_5, window_bounds = array<i64: 16, 256>}]} {
    %c0 = arith.constant 0 : index
    %c0_0 = arith.constant 0 : index
    %0 = vector.load %arg1[%c0, %c0_0] : memref<16x16xbf16, #tpu.memory_space<vmem>>, vector<16x16xbf16>
    %c0_1 = arith.constant 0 : index
    %c0_2 = arith.constant 0 : index
    %1 = vector.load %arg2[%c0_1, %c0_2] : memref<16x32xbf16, #tpu.memory_space<vmem>>, vector<16x32xbf16>
    %cst = arith.constant dense<0.000000e+00> : vector<16x32xf32>
    %2 = tpu.matmul %0, %1, %cst {dimension_numbers = #tpu.dot_dimension_numbers<[1], [0], [0], [1], [0, 0, 1, 1], [], []>} : vector<16x16xbf16>, vector<16x32xbf16>, vector<16x32xf32> -> vector<16x32xf32>
    %c0_3 = arith.constant 0 : index
    %c0_4 = arith.constant 0 : index
    %3 = vector.load %arg3[%c0_3, %c0_4] : memref<1x32xf32, #tpu.memory_space<vmem>>, vector<1x32xf32>
    %4 = vector.broadcast %3 : vector<1x32xf32> to vector<16x32xf32>
    %5 = arith.addf %2, %4 : vector<16x32xf32>
    %cst_5 = arith.constant 0.000000e+00 : f32
    %6 = vector.broadcast %cst_5 : f32 to vector<16x32xf32>
    %7 = arith.maximumf %5, %6 : vector<16x32xf32>
    %8 = arith.truncf %7 : vector<16x32xf32> to vector<16x32xbf16>
    %c0_6 = arith.constant 0 : index
    %c0_7 = arith.constant 0 : index
    %9 = vector.load %arg4[%c0_6, %c0_7] : memref<32x256xbf16, #tpu.memory_space<vmem>>, vector<32x256xbf16>
    %cst_8 = arith.constant dense<0.000000e+00> : vector<16x256xf32>
    %10 = tpu.matmul %8, %9, %cst_8 {dimension_numbers = #tpu.dot_dimension_numbers<[1], [0], [0], [1], [0, 0, 1, 1], [], []>} : vector<16x32xbf16>, vector<32x256xbf16>, vector<16x256xf32> -> vector<16x256xf32>
    %c0_9 = arith.constant 0 : index
    %c0_10 = arith.constant 0 : index
    %11 = vector.load %arg5[%c0_9, %c0_10] : memref<1x256xf32, #tpu.memory_space<vmem>>, vector<1x256xf32>
    %12 = vector.broadcast %11 : vector<1x256xf32> to vector<16x256xf32>
    %13 = arith.addf %10, %12 : vector<16x256xf32>
    %c0_11 = arith.constant 0 : index
    %c0_12 = arith.constant 0 : index
    %14 = vector.load %arg6[%c0_11, %c0_12] : memref<16x256xf32, #tpu.memory_space<vmem>>, vector<16x256xf32>
    tpu.vector_store %arg6[%c0_11, %c0_12], %13 {strides = array<i32>} : memref<16x256xf32, #tpu.memory_space<vmem>>, vector<16x256xf32>,
    return
  }
  func.func @transform_0(%arg0: i32) -> (i32, i32) {
    %c0_i32 = arith.constant 0 : i32
    %c0_i32_0 = arith.constant 0 : i32
    return %arg0, %c0_i32 : i32, i32
  }
  func.func @transform_1(%arg0: i32) -> (i32, i32) {
    %c0_i32 = arith.constant 0 : i32
    %c0_i32_0 = arith.constant 0 : i32
    %c0_i32_1 = arith.constant 0 : i32
    return %c0_i32, %c0_i32_0 : i32, i32
  }
  func.func @transform_2(%arg0: i32) -> (i32, i32) {
    %c0_i32 = arith.constant 0 : i32
    %c0_i32_0 = arith.constant 0 : i32
    %c0_i32_1 = arith.constant 0 : i32
    return %c0_i32, %c0_i32_0 : i32, i32
  }
  func.func @transform_3(%arg0: i32) -> (i32, i32) {
    %c0_i32 = arith.constant 0 : i32
    %c0_i32_0 = arith.constant 0 : i32
    %c0_i32_1 = arith.constant 0 : i32
    return %c0_i32, %c0_i32_0 : i32, i32
  }
  func.func @transform_4(%arg0: i32) -> (i32, i32) {
    %c0_i32 = arith.constant 0 : i32
    %c0_i32_0 = arith.constant 0 : i32
    %c0_i32_1 = arith.constant 0 : i32
    return %c0_i32, %c0_i32_0 : i32, i32
  }
  func.func @transform_5(%arg0: i32) -> (i32, i32) {
    %c0_i32 = arith.constant 0 : i32
    %c0_i32_0 = arith.constant 0 : i32
    return %arg0, %c0_i32 : i32, i32
  }
}

module attributes {stable_mosaic.version = 11 : i64} {
  func.func @_metanet_decoder_kernel(%arg0: i32, %arg1: memref<16x16xbf16, #tpu.memory_space<vmem>>, %arg2: memref<16x32xbf16, #tpu.memory_space<vmem>>, %arg3: memref<1x32xf32, #tpu.memory_space<vmem>>, %arg4: memref<32x256xbf16, #tpu.memory_space<vmem>>, %arg5: memref<1x256xf32, #tpu.memory_space<vmem>>, %arg6: memref<16x256xf32, #tpu.memory_space<vmem>>) attributes {dimension_semantics = [#tpu.dimension_semantics<parallel>], iteration_bounds = array<i64: 3>, scalar_prefetch = 0 : i64, scratch_operands = 0 : i64, tpu.core_type = #tpu.core_type<tc>, window_params = [{transform_indices = @transform_0, window_bounds = array<i64: 16, 16>}, {pipeline_mode = #tpu.pipeline_mode<synchronous>, transform_indices = @transform_1, window_bounds = array<i64: 16, 32>}, {pipeline_mode = #tpu.pipeline_mode<synchronous>, transform_indices = @transform_2, window_bounds = array<i64: 1, 32>}, {pipeline_mode = #tpu.pipeline_mode<synchronous>, transform_indices = @transform_3, window_bounds = array<i64: 32, 256>}, {pipeline_mode = #tpu.pipeline_mode<synchronous>, transform_indices = @transform_4, window_bounds = array<i64: 1, 256>}, {transform_indices = @transform_5, window_bounds = array<i64: 16, 256>}]} {
    %c0 = arith.constant 0 : index
    %c0_0 = arith.constant 0 : index
    %0 = vector.load %arg1[%c0, %c0_0] : memref<16x16xbf16, #tpu.memory_space<vmem>>, vector<16x16xbf16>
    %c0_1 = arith.constant 0 : index
    %c0_2 = arith.constant 0 : index
    %1 = vector.load %arg2[%c0_1, %c0_2] : memref<16x32xbf16, #tpu.memory_space<vmem>>, vector<16x32xbf16>
    %cst = arith.constant dense<0.000000e+00> : vector<16x32xf32>
    %2 = tpu.matmul %0, %1, %cst {dimension_numbers = #tpu.dot_dimension_numbers<[1], [0], [0], [1], [0, 0, 1, 1], [], []>} : vector<16x16xbf16>, vector<16x32xbf16>, vector<16x32xf32> -> vector<16x32xf32>
    %c0_3 = arith.constant 0 : index
    %c0_4 = arith.constant 0 : index
    %3 = vector.load %arg3[%c0_3, %c0_4] : memref<1x32xf32, #tpu.memory_space<vmem>>, vector<1x32xf32>
    %4 = vector.broadcast %3 : vector<1x32xf32> to vector<16x32xf32>
    %5 = arith.addf %2, %4 : vector<16x32xf32>
    %cst_5 = arith.constant 0.000000e+00 : f32
    %6 = vector.broadcast %cst_5 : f32 to vector<16x32xf32>
    %7 = arith.maximumf %5, %6 : vector<16x32xf32>
    %8 = arith.truncf %7 : vector<16x32xf32> to vector<16x32xbf16>
    %c0_6 = arith.constant 0 : index
    %c0_7 = arith.constant 0 : index
    %9 = vector.load %arg4[%c0_6, %c0_7] : memref<32x256xbf16, #tpu.memory_space<vmem>>, vector<32x256xbf16>
    %cst_8 = arith.constant dense<0.000000e+00> : vector<16x256xf32>
    %10 = tpu.matmul %8, %9, %cst_8 {dimension_numbers = #tpu.dot_dimension_numbers<[1], [0], [0], [1], [0, 0, 1, 1], [], []>} : vector<16x32xbf16>, vector<32x256xbf16>, vector<16x256xf32> -> vector<16x256xf32>
    %c0_9 = arith.constant 0 : index
    %c0_10 = arith.constant 0 : index
    %11 = vector.load %arg5[%c0_9, %c0_10] : memref<1x256xf32, #tpu.memory_space<vmem>>, vector<1x256xf32>
    %12 = vector.broadcast %11 : vector<1x256xf32> to vector<16x256xf32>
    %13 = arith.addf %10, %12 : vector<16x256xf32>
    %c0_11 = arith.constant 0 : index
    %c0_12 = arith.constant 0 : index
    %14 = vector.load %arg6[%c0_11, %c0_12] : memref<16x256xf32, #tpu.memory_space<vmem>>, vector<16x256xf32>
    tpu.vector_store %arg6[%c0_11, %c0_12], %13 {strides = array<i32>} : memref<16x256xf32, #tpu.memory_space<vmem>>, vector<16x256xf32>,
    return
  }
  func.func @transform_0(%arg0: i32) -> (i32, i32) {
    %c0_i32 = arith.constant 0 : i32
    %c0_i32_0 = arith.constant 0 : i32
    return %arg0, %c0_i32 : i32, i32
  }
  func.func @transform_1(%arg0: i32) -> (i32, i32) {
    %c0_i32 = arith.constant 0 : i32
    %c0_i32_0 = arith.constant 0 : i32
    %c0_i32_1 = arith.constant 0 : i32
    return %c0_i32, %c0_i32_0 : i32, i32
  }
  func.func @transform_2(%arg0: i32) -> (i32, i32) {
    %c0_i32 = arith.constant 0 : i32
    %c0_i32_0 = arith.constant 0 : i32
    %c0_i32_1 = arith.constant 0 : i32
    return %c0_i32, %c0_i32_0 : i32, i32
  }
  func.func @transform_3(%arg0: i32) -> (i32, i32) {
    %c0_i32 = arith.constant 0 : i32
    %c0_i32_0 = arith.constant 0 : i32
    %c0_i32_1 = arith.constant 0 : i32
    return %c0_i32, %c0_i32_0 : i32, i32
  }
  func.func @transform_4(%arg0: i32) -> (i32, i32) {
    %c0_i32 = arith.constant 0 : i32
    %c0_i32_0 = arith.constant 0 : i32
    %c0_i32_1 = arith.constant 0 : i32
    return %c0_i32, %c0_i32_0 : i32, i32
  }
  func.func @transform_5(%arg0: i32) -> (i32, i32) {
    %c0_i32 = arith.constant 0 : i32
    %c0_i32_0 = arith.constant 0 : i32
    return %arg0, %c0_i32 : i32, i32
  }
}

</mosaic_0001>

<bundles_post_ra>
// kernel: tpu_custom_call.1
= control target key start
LH: loop header
LB: loop body
LE: loop exit
PB: predicated region body
PF: predicated region fallthrough
CT: control target
= control target key end

     0   :  { %10 = vsyncpa [#allocation3], 0  ;;  %s929_s0 = inlined_call_operand.vmem [shape: bf16[40,16], index: 0, kind: input, shape index: {}]   ;;  %s930_s1 = inlined_call_operand.hbm [shape: bf16[16,32], index: 1, kind: input, shape index: {}]   ;;  %s931_s2 = inlined_call_operand.vmem [shape: f32[1,32], index: 2, kind: input, shape index: {}]   ;;  %s932_s3 = inlined_call_operand.vmem [shape: bf16[32,256], index: 3, kind: input, shape index: {}]   ;;  %s933_s4 = inlined_call_operand.vmem [shape: f32[1,256], index: 4, kind: input, shape index: {}]   ;;  %s934_s5 = inlined_call_operand.hbm [shape: f32[40,256], index: 5, kind: output, shape index: {}]  }
   0x1   :  { %11 = vsyncpa [#allocation4], 0 }
   0x2   :  { %13 = vsyncpa [#allocation4 + $0x1], 0  ;;  %s759_s18 = smov 0   ;;  %s761_s19 = smov 0  }
   0x3   :  { %s763_s20 = smov 0   ;;  %s765_s21 = smov 0  }
   0x4 LB: > { %s780_s22 = sadd.s32 4294967295, %s718_s21   ;;  %s520_s23 = sadd.s32 4294967294, %s718_s21   ;;  %s718_s21 = sphi %s765_s21, %s949_s21   ;;  %s714_s20 = sphi %s763_s20, %s948_s20   ;;  %s710_s19 = sphi %s761_s19, %s947_s19   ;;  %s706_s18 = sphi %s759_s18, %s946_s18  }
   0x5   : > { %s784_s24 = sadd.s32 1, %s718_s21   ;;  %s136_s25 = sadd.s32 1, %s714_s20 }
   0x6   : > { %s133_s26 = ssub.s32 %s718_s21, %s784_s24  ;;  %p146_p0 = scmp.ne.s32.totalorder %s714_s20, %s710_s19 }
   0x7   : > { %p134_p1 = scmp.eq.s32.totalorder %s133_s26, 0  ;;  %p147_p2 = scmp.eq.s32.totalorder %s780_s22, 2 }
   0x8   : > { %p152_p3 = scmp.ne.s32.totalorder %s710_s19, %s706_s18  ;;  %p153_p4 = scmp.eq.s32.totalorder %s520_s23, 2 }
   0x9   : > { %s795_s27 = scalar_select %p134_p1, %s714_s20, %s136_s25  }
   0xa   : > { %p797_p5 = por %p147_p2, %p146_p0  ;;  %p801_p6 = por %p153_p4, %p152_p3 }
   0xb   : > { %p521_p7 = scmp.ge.s32.totalorder %s718_s21, 1  ;;  %p160_p8 = scmp.lt.s32.totalorder %s718_s21, 4 }
   0xc   : > { %s937_s28 = scalar_select %p797_p5, 1, 0 }
   0xd   : > { %s938_s29 = scalar_select %p801_p6, 1, 0 }
   0xe   : > { %p935_p9 = scmp.eq.s32.totalorder %s780_s22, 0  ;;  %p808_p10 = pnand %p521_p7, %p160_p8 }
   0xf   : > { %s720_s6 = smov [#allocation2]   ;;  %s624_s11 = scalar_lea.hbm %s930_s1, 128 }
  0x10   : > { %s939_s30 = scalar_select %p808_p10, 1, 0 }
  0x11   : > { %s172_s7 = sshll.u32 %s720_s6, 4  ;;  %p565_p11 = pneg %p808_p10  ;;  %s173_s7 = int_to_ptr.vmem [resolvable:$true] %s172_s7 }
  0x12   : > { %p625_p13 = scmp.ne.s32.totalorder %s930_s1, %s624_s11  ;;  %p631_p3 = scmp.lt.u32.totalorder %s624_s11, %s930_s1 }
  0x13   : > { %p816_p12 = pnand %p935_p9, %p565_p11 }
  0x15   : > { %p626_p0 = pneg %p816_p12 }
  0x17   : > { %p627_p1 = pnand %p626_p0, %p625_p13 }
  0x19   : > { %p628_p2 = pneg %p627_p1 }
  0x1b   : > { %p633_p4 = pnand %p631_p3, %p628_p2 }
  0x1d   : > { %636 = shalt.err (!%p633_p4)
}
  0x1e   : > { %s637_s16 = scalar_lea.vmem %s173_s7, 128  ;;  %p645_p9 = scmp.lt.s32.totalorder %s173_s7, %s173_s7 }
  0x1f   : > { %p638_p7 = scmp.ne.s32.totalorder %s173_s7, %s637_s16  ;;  %p646_p6 = scmp.lt.s32.totalorder %s637_s16, %s637_s16 }
  0x21   : > { %p640_p8 = pnand %p638_p7, %p626_p0  ;;  %p647_p5 = por %p646_p6, %p645_p9 }
  0x23   : > { %p641_p11 = pneg %p640_p8 }
  0x25   : > { %p648_p10 = pnand %p647_p5, %p641_p11 }
  0x27   : > { %651 = shalt.err (!%p648_p10)
}
  0x28   : > { %s721_s17 = smov 64   ;;  %s722_s23 = smov 4  }
  0x29   : > { %568 = dma.hbm_to_vmem [thread:$0]  (!%p816_p12), %s930_s1, 128, %s173_s7, [#allocation3], %s721_s17, %s721_s17, %s722_s23  }
  0x2a   : > { %p941_p13 = scmp.ne.s32.totalorder %s939_s30, 0 }
  0x2b   : > { %p942_p1 = scmp.eq.s32.totalorder (!%p941_p13), %s780_s22, 0 }
  0x2c   : > { %214 = sbr.rel (%p941_p13) target bundleno = 526 (0x20e), region = 40 }
  0x33   : > { %697 = dma.done.wait (%p942_p1), [#allocation3], 128   ;;  %p943_p0 = pmov %p942_p1 }
  0x34   : > { %s843_s6 = sshll.u32 %s780_s22, 1  ;;  %v723_v0 = vmov 0.0   ;;  %vm724_vm0 = vmmov 0   ;;  %v616_v1 = vld [vmem:[#allocation2] sm:$0xff]   ;;  %vm289_vm1 = vcmask 130048   ;;  %v725_v7 = vmov 0  }
  0x35   : > { %699 = vsyncadd (%p943_p0), [#allocation3], 4294967168  ;;  %554 = vmatprep.subr.bf16.mxu0 %v723_v0  ;;  %556 = vmatprep.mubr.msk.bf16.mxu0 %vm724_vm0, %v723_v0  ;;  %p251_p5 = scmp.lt.s32.totalorder %s843_s6, 4  ;;  %v618_v3 = vld [vmem:[%s932_s3 + $0x4] ss:$8 sps:$4 sm:$0xff]   ;;  %vm373_vm2 = vcmask 261120   ;;  %v343_v18 = vlaneseq }
  0x36   : > { %555 = vmatpush3.bf16.msra.mxu0 %v616_v1  ;;  %v620_v4 = vld [vmem:[%s932_s3] ss:$8 sps:$4 sm:$0xff]   ;;  %377 = vmatprep.subr.bf16.mxu1 %v618_v3  ;;  %v621_v5 = vld [vmem:[%s932_s3 + $0x14] ss:$8 sps:$4 sm:$0xff]   ;;  %v623_v6 = vld [vmem:[%s932_s3 + $0x10] ss:$8 sps:$4 sm:$0xff]  }
  0x37   : > { %s252_s7 = scalar_select %p251_p5, %s843_s6, 4  ;;  %378 = vmatpush1.bf16.msra.mxu1 %v620_v4  ;;  %409 = vmatprep.mubr.bf16.mxu1 %v725_v7  ;;  %v529_v8 = vld [vmem:[%s931_s2] ss:$0 sm:$0xff]  ;;  %v344_v19 = vshrl.u32 %v343_v18, 7 }
  0x38   : > { %379 = vmatprep.subr.bf16.mxu1 %v621_v5  ;;  %v341_v21 = vld [vmem:[%s933_s4] sm:$0x3]  ;;  %p944_p6 = scmp.ne.s32.totalorder %s937_s28, 0 }
  0x39   : > { %s528_s8 = sshll.u32 %s252_s7, 2  ;;  %s243_s7 = sand.u32 1, %s710_s19   ;;  %v345_v20 = vsub.s32 0, %v344_v19  ;;  %v349_v22 = vsub.s32 1, %v344_v19 }
  0x3a   : > { %s254_s10 = scalar_lea.vmem %s929_s0, %s528_s8  ;;  %s526_s9 = sshll.u32 %s243_s7, 5 }
  0x3b   : > { %v617_v2 = vld [vmem:[%s254_s10] sm:$0xff]   ;;  %380 = vmatpush1.bf16.msra.mxu1 %v623_v6  ;;  %v346_v23 = vrot.slane %v341_v21, %v345_v20  ;;  %v350_v24 = vrot.slane %v341_v21, %v349_v22  ;;  %s245_s10 = scalar_lea.vmem [#allocation5], %s526_s9  ;;  %s869_s11 = scalar_lea.sflag [#allocation4], %s243_s7 }
  0x3c   : > { %557 = vmatmul.mubr.msk.bf16.vlgmr.msra.gmra.mrb[0].mxu0 %vm289_vm1, %v617_v2  ;;  %s433_s12 = ssub.s32 (%p944_p6), 5, %s843_s6 }
  0x3d   : > { %p434_p9 = scmp.lt.s32.totalorder (%p944_p6), %s433_s12, 2 }
 0x10f   : > { %v327_v9 = vpop.f32.mrb[0].mxu0 }
 0x110   : > { %v328_v10 = vadd.f32 %v529_v8, %v327_v9  ;;  %v558_v11 = vpop.f32.mrb[1].mxu0 }
 0x111   : > { %v330_v12 = vpop.f32.mrb[2].mxu0 }
 0x112   : > { %v331_v13 = vadd.f32 %v529_v8, %v330_v12  ;;  %v559_v14 = vpop.f32.mrb[3].mxu0  ;;  %v334_v15 = vmax.f32 %v328_v10, 0.0 }
 0x114   : > { %v335_v16 = vmax.f32 %v331_v13, 0.0 }
 0x116   : > { %v336_v17 = vpack.c.bf16 %v335_v16, %v334_v15 }
 0x118   : > { %537 = vmatmul.mubr.msk.bf16.vlgmr.msra.gmra.mrb[0].mxu1 %vm373_vm2, %v336_v17 }
 0x1eb   : > { %v411_v25 = vpop.f32.mrb[0].mxu1  ;;  %431 = sbr.rel (!%p944_p6) target bundleno = 526 (0x20e), region = 48 }
 0x1ec   : > { %v412_v26 = vadd.f32 %v411_v25, %v346_v23  ;;  %v413_v27 = vpop.f32.mrb[1].mxu1 }
 0x1ed   : > { %v414_v28 = vadd.f32 %v413_v27, %v350_v24  ;;  %v415_v29 = vpop.f32.mrb[2].mxu1 }
 0x1ee   : > { %420 = vst [vmem:[%s245_s10] sm:$0xff] %v412_v26  ;;  %v416_v30 = vadd.f32 %v415_v29, %v346_v23  ;;  %v417_v31 = vpop.f32.mrb[3].mxu1 }
 0x1ef   : > { %421 = vst [vmem:[%s245_s10 + $0x8] sm:$0xff] %v414_v28  ;;  %v418_v32 = vadd.f32 %v417_v31, %v350_v24 }
 0x1f0   : > { %422 = vst [vmem:[%s245_s10 + $0x10] sm:$0xff] %v416_v30 }
 0x1f1   : > { %423 = vst [vmem:[%s245_s10 + $0x18] sm:$0xff] %v418_v32 }
 0x1f2   : > { %s951_s12 = smov (!%p434_p9, %s433_s12), 2 }
 0x1f3   : > { %s874_s13 = sshll.u32 %s951_s12, 8 }
 0x1f4   : > { %s439_s14 = ssub.s32 512, %s874_s13 }
 0x1f5   : > { %440 = vsyncadd %s869_s11, %s439_s14  ;;  %p542_p10 = scmp.ne.s32.totalorder %s874_s13, 0  ;;  %s551_s15 = sshll.u32 %s780_s22, 9 }
 0x1f6   : > { %s883_s28 = scalar_lea.hbm %s934_s5, %s551_s15  ;;  %s446_s23 = sshll.u32 %s245_s10, 4  ;;  %s885_s23 = int_to_ptr.vmem [resolvable:$true] %s446_s23 }
 0x1f7   : > { %s652_s6 = scalar_lea.vmem %s885_s23, %s874_s13  ;;  %s726_s25 = smov [#allocation5]  }
 0x1f8   : > { %p653_p12 = scmp.ne.s32.totalorder %s885_s23, %s652_s6  ;;  %s656_s26 = sshll.u32 %s726_s25, 4  ;;  %s657_s26 = int_to_ptr.vmem [resolvable:$false] %s656_s26 }
 0x1f9   : > { %s658_s22 = scalar_lea.vmem %s657_s26, 1024  ;;  %p659_p4 = scmp.lt.s32.totalorder %s885_s23, %s657_s26 }
 0x1fa   : > { %p654_p2 = pnand %p653_p12, %p542_p10  ;;  %p660_p7 = scmp.lt.s32.totalorder %s658_s22, %s652_s6 }
 0x1fc   : > { %p655_p3 = pneg %p654_p2  ;;  %p661_p8 = por %p660_p7, %p659_p4 }
 0x1fe   : > { %p662_p11 = pnand %p661_p8, %p655_p3 }
 0x200   : > { %665 = shalt.err (!%p662_p11)
}
 0x201   : > { %s666_s7 = scalar_lea.hbm %s883_s28, %s874_s13  ;;  %s670_s9 = scalar_lea.hbm %s934_s5, 1280 }
 0x202   : > { %p667_p13 = scmp.ne.s32.totalorder %s883_s28, %s666_s7  ;;  %p671_p5 = scmp.lt.u32.totalorder %s883_s28, %s934_s5 }
 0x203   : > { %p672_p6 = scmp.lt.u32.totalorder %s670_s9, %s666_s7  ;;  %p674_p12 = scmp.lt.u32.totalorder %s666_s7, %s883_s28 }
 0x204   : > { %p668_p1 = pnand %p667_p13, %p542_p10 }
 0x205   : > { %p673_p9 = por %p672_p6, %p671_p5 }
 0x206   : > { %p669_p0 = pneg %p668_p1 }
 0x207   : > { %p675_p2 = por %p674_p12, %p673_p9 }
 0x209   : > { %p676_p3 = pnand %p675_p2, %p669_p0 }
 0x20b   : > { %679 = shalt.err (!%p676_p3)
}
 0x20c   : > { %s727_s14 = smov 256   ;;  %s728_s15 = smov 16  }
 0x20d   : > { %452 = dma.vmem_to_hbm [thread:$0]  (%p542_p10), %s885_s23, %s874_s13, %s883_s28, %s869_s11, %s727_s14, %s727_s14, %s728_s15  }
 0x20e PF: > { %p575_p4 = scmp.ge.s32.totalorder %s718_s21, 2  ;;  %s461_s16 = sand.u32 1, %s706_s18  }
 0x20f   : > { %p945_p7 = scmp.ne.s32.totalorder %s938_s29, 0  ;;  %s462_s17 = scalar_lea.sflag [#allocation4], %s461_s16 }
 0x211   : > { %p570_p8 = pnand %p575_p4, %p945_p7 }
 0x213   : > { %701 = dma.done.wait (!%p570_p8), %s462_s17, 512  }
 0x214   : > { %703 = vsyncadd (!%p570_p8), %s462_s17, 4294966784  ;;  %p16_p11 = scmp.ge.s32.totalorder %s784_s24, 5   ;;  %s946_s18 = smov %s710_s19 }
 0x215   : > { %s947_s19 = smov %s714_s20  ;;  %s948_s20 = smov %s795_s27 }
 0x216   : > { %s949_s21 = smov %s784_s24  ;;  %18 = sbr.rel (!%p16_p11) target bundleno = 4 (0x4), region = 80 }
 0x21d   :  { %467 = vsyncpa [#allocation3], 1 }
 0x21e   :  { %469 = vsyncpa [#allocation3 + $0x1], 1 }
 0x21f   :  { %470 = vsyncpa [#allocation4], 1 }
 0x220   :  { %472 = vsyncpa [#allocation4 + $0x1], 1 }

// kernel: tpu_custom_call.1
= control target key start
LH: loop header
LB: loop body
LE: loop exit
PB: predicated region body
PF: predicated region fallthrough
CT: control target
= control target key end

     0   :  { %10 = vsyncpa [#allocation3], 0  ;;  %s929_s0 = inlined_call_operand.vmem [shape: bf16[40,16], index: 0, kind: input, shape index: {}]   ;;  %s930_s1 = inlined_call_operand.hbm [shape: bf16[16,32], index: 1, kind: input, shape index: {}]   ;;  %s931_s2 = inlined_call_operand.vmem [shape: f32[1,32], index: 2, kind: input, shape index: {}]   ;;  %s932_s3 = inlined_call_operand.vmem [shape: bf16[32,256], index: 3, kind: input, shape index: {}]   ;;  %s933_s4 = inlined_call_operand.vmem [shape: f32[1,256], index: 4, kind: input, shape index: {}]   ;;  %s934_s5 = inlined_call_operand.hbm [shape: f32[40,256], index: 5, kind: output, shape index: {}]  }
   0x1   :  { %11 = vsyncpa [#allocation4], 0 }
   0x2   :  { %13 = vsyncpa [#allocation4 + $0x1], 0  ;;  %s759_s18 = smov 0   ;;  %s761_s19 = smov 0  }
   0x3   :  { %s763_s20 = smov 0   ;;  %s765_s21 = smov 0  }
   0x4 LB: > { %s780_s22 = sadd.s32 4294967295, %s718_s21   ;;  %s520_s23 = sadd.s32 4294967294, %s718_s21   ;;  %s718_s21 = sphi %s765_s21, %s949_s21   ;;  %s714_s20 = sphi %s763_s20, %s948_s20   ;;  %s710_s19 = sphi %s761_s19, %s947_s19   ;;  %s706_s18 = sphi %s759_s18, %s946_s18  }
   0x5   : > { %s784_s24 = sadd.s32 1, %s718_s21   ;;  %s136_s25 = sadd.s32 1, %s714_s20 }
   0x6   : > { %s133_s26 = ssub.s32 %s718_s21, %s784_s24  ;;  %p146_p0 = scmp.ne.s32.totalorder %s714_s20, %s710_s19 }
   0x7   : > { %p134_p1 = scmp.eq.s32.totalorder %s133_s26, 0  ;;  %p147_p2 = scmp.eq.s32.totalorder %s780_s22, 2 }
   0x8   : > { %p152_p3 = scmp.ne.s32.totalorder %s710_s19, %s706_s18  ;;  %p153_p4 = scmp.eq.s32.totalorder %s520_s23, 2 }
   0x9   : > { %s795_s27 = scalar_select %p134_p1, %s714_s20, %s136_s25  }
   0xa   : > { %p797_p5 = por %p147_p2, %p146_p0  ;;  %p801_p6 = por %p153_p4, %p152_p3 }
   0xb   : > { %p521_p7 = scmp.ge.s32.totalorder %s718_s21, 1  ;;  %p160_p8 = scmp.lt.s32.totalorder %s718_s21, 4 }
   0xc   : > { %s937_s28 = scalar_select %p797_p5, 1, 0 }
   0xd   : > { %s938_s29 = scalar_select %p801_p6, 1, 0 }
   0xe   : > { %p935_p9 = scmp.eq.s32.totalorder %s780_s22, 0  ;;  %p808_p10 = pnand %p521_p7, %p160_p8 }
   0xf   : > { %s720_s6 = smov [#allocation2]   ;;  %s624_s11 = scalar_lea.hbm %s930_s1, 128 }
  0x10   : > { %s939_s30 = scalar_select %p808_p10, 1, 0 }
  0x11   : > { %s172_s7 = sshll.u32 %s720_s6, 4  ;;  %p565_p11 = pneg %p808_p10  ;;  %s173_s7 = int_to_ptr.vmem [resolvable:$true] %s172_s7 }
  0x12   : > { %p625_p13 = scmp.ne.s32.totalorder %s930_s1, %s624_s11  ;;  %p631_p3 = scmp.lt.u32.totalorder %s624_s11, %s930_s1 }
  0x13   : > { %p816_p12 = pnand %p935_p9, %p565_p11 }
  0x15   : > { %p626_p0 = pneg %p816_p12 }
  0x17   : > { %p627_p1 = pnand %p626_p0, %p625_p13 }
  0x19   : > { %p628_p2 = pneg %p627_p1 }
  0x1b   : > { %p633_p4 = pnand %p631_p3, %p628_p2 }
  0x1d   : > { %636 = shalt.err (!%p633_p4)
}
  0x1e   : > { %s637_s16 = scalar_lea.vmem %s173_s7, 128  ;;  %p645_p9 = scmp.lt.s32.totalorder %s173_s7, %s173_s7 }
  0x1f   : > { %p638_p7 = scmp.ne.s32.totalorder %s173_s7, %s637_s16  ;;  %p646_p6 = scmp.lt.s32.totalorder %s637_s16, %s637_s16 }
  0x21   : > { %p640_p8 = pnand %p638_p7, %p626_p0  ;;  %p647_p5 = por %p646_p6, %p645_p9 }
  0x23   : > { %p641_p11 = pneg %p640_p8 }
  0x25   : > { %p648_p10 = pnand %p647_p5, %p641_p11 }
  0x27   : > { %651 = shalt.err (!%p648_p10)
}
  0x28   : > { %s721_s17 = smov 64   ;;  %s722_s23 = smov 4  }
  0x29   : > { %568 = dma.hbm_to_vmem [thread:$0]  (!%p816_p12), %s930_s1, 128, %s173_s7, [#allocation3], %s721_s17, %s721_s17, %s722_s23  }
  0x2a   : > { %p941_p13 = scmp.ne.s32.totalorder %s939_s30, 0 }
  0x2b   : > { %p942_p1 = scmp.eq.s32.totalorder (!%p941_p13), %s780_s22, 0 }
  0x2c   : > { %214 = sbr.rel (%p941_p13) target bundleno = 526 (0x20e), region = 40 }
  0x33   : > { %697 = dma.done.wait (%p942_p1), [#allocation3], 128   ;;  %p943_p0 = pmov %p942_p1 }
  0x34   : > { %s843_s6 = sshll.u32 %s780_s22, 1  ;;  %v723_v0 = vmov 0.0   ;;  %vm724_vm0 = vmmov 0   ;;  %v616_v1 = vld [vmem:[#allocation2] sm:$0xff]   ;;  %vm289_vm1 = vcmask 130048   ;;  %v725_v7 = vmov 0  }
  0x35   : > { %699 = vsyncadd (%p943_p0), [#allocation3], 4294967168  ;;  %554 = vmatprep.subr.bf16.mxu0 %v723_v0  ;;  %556 = vmatprep.mubr.msk.bf16.mxu0 %vm724_vm0, %v723_v0  ;;  %p251_p5 = scmp.lt.s32.totalorder %s843_s6, 4  ;;  %v618_v3 = vld [vmem:[%s932_s3 + $0x4] ss:$8 sps:$4 sm:$0xff]   ;;  %vm373_vm2 = vcmask 261120   ;;  %v343_v18 = vlaneseq }
  0x36   : > { %555 = vmatpush3.bf16.msra.mxu0 %v616_v1  ;;  %v620_v4 = vld [vmem:[%s932_s3] ss:$8 sps:$4 sm:$0xff]   ;;  %377 = vmatprep.subr.bf16.mxu1 %v618_v3  ;;  %v621_v5 = vld [vmem:[%s932_s3 + $0x14] ss:$8 sps:$4 sm:$0xff]   ;;  %v623_v6 = vld [vmem:[%s932_s3 + $0x10] ss:$8 sps:$4 sm:$0xff]  }
  0x37   : > { %s252_s7 = scalar_select %p251_p5, %s843_s6, 4  ;;  %378 = vmatpush1.bf16.msra.mxu1 %v620_v4  ;;  %409 = vmatprep.mubr.bf16.mxu1 %v725_v7  ;;  %v529_v8 = vld [vmem:[%s931_s2] ss:$0 sm:$0xff]  ;;  %v344_v19 = vshrl.u32 %v343_v18, 7 }
  0x38   : > { %379 = vmatprep.subr.bf16.mxu1 %v621_v5  ;;  %v341_v21 = vld [vmem:[%s933_s4] sm:$0x3]  ;;  %p944_p6 = scmp.ne.s32.totalorder %s937_s28, 0 }
  0x39   : > { %s528_s8 = sshll.u32 %s252_s7, 2  ;;  %s243_s7 = sand.u32 1, %s710_s19   ;;  %v345_v20 = vsub.s32 0, %v344_v19  ;;  %v349_v22 = vsub.s32 1, %v344_v19 }
  0x3a   : > { %s254_s10 = scalar_lea.vmem %s929_s0, %s528_s8  ;;  %s526_s9 = sshll.u32 %s243_s7, 5 }
  0x3b   : > { %v617_v2 = vld [vmem:[%s254_s10] sm:$0xff]   ;;  %380 = vmatpush1.bf16.msra.mxu1 %v623_v6  ;;  %v346_v23 = vrot.slane %v341_v21, %v345_v20  ;;  %v350_v24 = vrot.slane %v341_v21, %v349_v22  ;;  %s245_s10 = scalar_lea.vmem [#allocation5], %s526_s9  ;;  %s869_s11 = scalar_lea.sflag [#allocation4], %s243_s7 }
  0x3c   : > { %557 = vmatmul.mubr.msk.bf16.vlgmr.msra.gmra.mrb[0].mxu0 %vm289_vm1, %v617_v2  ;;  %s433_s12 = ssub.s32 (%p944_p6), 5, %s843_s6 }
  0x3d   : > { %p434_p9 = scmp.lt.s32.totalorder (%p944_p6), %s433_s12, 2 }
 0x10f   : > { %v327_v9 = vpop.f32.mrb[0].mxu0 }
 0x110   : > { %v328_v10 = vadd.f32 %v529_v8, %v327_v9  ;;  %v558_v11 = vpop.f32.mrb[1].mxu0 }
 0x111   : > { %v330_v12 = vpop.f32.mrb[2].mxu0 }
 0x112   : > { %v331_v13 = vadd.f32 %v529_v8, %v330_v12  ;;  %v559_v14 = vpop.f32.mrb[3].mxu0  ;;  %v334_v15 = vmax.f32 %v328_v10, 0.0 }
 0x114   : > { %v335_v16 = vmax.f32 %v331_v13, 0.0 }
 0x116   : > { %v336_v17 = vpack.c.bf16 %v335_v16, %v334_v15 }
 0x118   : > { %537 = vmatmul.mubr.msk.bf16.vlgmr.msra.gmra.mrb[0].mxu1 %vm373_vm2, %v336_v17 }
 0x1eb   : > { %v411_v25 = vpop.f32.mrb[0].mxu1  ;;  %431 = sbr.rel (!%p944_p6) target bundleno = 526 (0x20e), region = 48 }
 0x1ec   : > { %v412_v26 = vadd.f32 %v411_v25, %v346_v23  ;;  %v413_v27 = vpop.f32.mrb[1].mxu1 }
 0x1ed   : > { %v414_v28 = vadd.f32 %v413_v27, %v350_v24  ;;  %v415_v29 = vpop.f32.mrb[2].mxu1 }
 0x1ee   : > { %420 = vst [vmem:[%s245_s10] sm:$0xff] %v412_v26  ;;  %v416_v30 = vadd.f32 %v415_v29, %v346_v23  ;;  %v417_v31 = vpop.f32.mrb[3].mxu1 }
 0x1ef   : > { %421 = vst [vmem:[%s245_s10 + $0x8] sm:$0xff] %v414_v28  ;;  %v418_v32 = vadd.f32 %v417_v31, %v350_v24 }
 0x1f0   : > { %422 = vst [vmem:[%s245_s10 + $0x10] sm:$0xff] %v416_v30 }
 0x1f1   : > { %423 = vst [vmem:[%s245_s10 + $0x18] sm:$0xff] %v418_v32 }
 0x1f2   : > { %s951_s12 = smov (!%p434_p9, %s433_s12), 2 }
 0x1f3   : > { %s874_s13 = sshll.u32 %s951_s12, 8 }
 0x1f4   : > { %s439_s14 = ssub.s32 512, %s874_s13 }
 0x1f5   : > { %440 = vsyncadd %s869_s11, %s439_s14  ;;  %p542_p10 = scmp.ne.s32.totalorder %s874_s13, 0  ;;  %s551_s15 = sshll.u32 %s780_s22, 9 }
 0x1f6   : > { %s883_s28 = scalar_lea.hbm %s934_s5, %s551_s15  ;;  %s446_s23 = sshll.u32 %s245_s10, 4  ;;  %s885_s23 = int_to_ptr.vmem [resolvable:$true] %s446_s23 }
 0x1f7   : > { %s652_s6 = scalar_lea.vmem %s885_s23, %s874_s13  ;;  %s726_s25 = smov [#allocation5]  }
 0x1f8   : > { %p653_p12 = scmp.ne.s32.totalorder %s885_s23, %s652_s6  ;;  %s656_s26 = sshll.u32 %s726_s25, 4  ;;  %s657_s26 = int_to_ptr.vmem [resolvable:$false] %s656_s26 }
 0x1f9   : > { %s658_s22 = scalar_lea.vmem %s657_s26, 1024  ;;  %p659_p4 = scmp.lt.s32.totalorder %s885_s23, %s657_s26 }
 0x1fa   : > { %p654_p2 = pnand %p653_p12, %p542_p10  ;;  %p660_p7 = scmp.lt.s32.totalorder %s658_s22, %s652_s6 }
 0x1fc   : > { %p655_p3 = pneg %p654_p2  ;;  %p661_p8 = por %p660_p7, %p659_p4 }
 0x1fe   : > { %p662_p11 = pnand %p661_p8, %p655_p3 }
 0x200   : > { %665 = shalt.err (!%p662_p11)
}
 0x201   : > { %s666_s7 = scalar_lea.hbm %s883_s28, %s874_s13  ;;  %s670_s9 = scalar_lea.hbm %s934_s5, 1280 }
 0x202   : > { %p667_p13 = scmp.ne.s32.totalorder %s883_s28, %s666_s7  ;;  %p671_p5 = scmp.lt.u32.totalorder %s883_s28, %s934_s5 }
 0x203   : > { %p672_p6 = scmp.lt.u32.totalorder %s670_s9, %s666_s7  ;;  %p674_p12 = scmp.lt.u32.totalorder %s666_s7, %s883_s28 }
 0x204   : > { %p668_p1 = pnand %p667_p13, %p542_p10 }
 0x205   : > { %p673_p9 = por %p672_p6, %p671_p5 }
 0x206   : > { %p669_p0 = pneg %p668_p1 }
 0x207   : > { %p675_p2 = por %p674_p12, %p673_p9 }
 0x209   : > { %p676_p3 = pnand %p675_p2, %p669_p0 }
 0x20b   : > { %679 = shalt.err (!%p676_p3)
}
 0x20c   : > { %s727_s14 = smov 256   ;;  %s728_s15 = smov 16  }
 0x20d   : > { %452 = dma.vmem_to_hbm [thread:$0]  (%p542_p10), %s885_s23, %s874_s13, %s883_s28, %s869_s11, %s727_s14, %s727_s14, %s728_s15  }
 0x20e PF: > { %p575_p4 = scmp.ge.s32.totalorder %s718_s21, 2  ;;  %s461_s16 = sand.u32 1, %s706_s18  }
 0x20f   : > { %p945_p7 = scmp.ne.s32.totalorder %s938_s29, 0  ;;  %s462_s17 = scalar_lea.sflag [#allocation4], %s461_s16 }
 0x211   : > { %p570_p8 = pnand %p575_p4, %p945_p7 }
 0x213   : > { %701 = dma.done.wait (!%p570_p8), %s462_s17, 512  }
 0x214   : > { %703 = vsyncadd (!%p570_p8), %s462_s17, 4294966784  ;;  %p16_p11 = scmp.ge.s32.totalorder %s784_s24, 5   ;;  %s946_s18 = smov %s710_s19 }
 0x215   : > { %s947_s19 = smov %s714_s20  ;;  %s948_s20 = smov %s795_s27 }
 0x216   : > { %s949_s21 = smov %s784_s24  ;;  %18 = sbr.rel (!%p16_p11) target bundleno = 4 (0x4), region = 80 }
 0x21d   :  { %467 = vsyncpa [#allocation3], 1 }
 0x21e   :  { %469 = vsyncpa [#allocation3 + $0x1], 1 }
 0x21f   :  { %470 = vsyncpa [#allocation4], 1 }
 0x220   :  { %472 = vsyncpa [#allocation4 + $0x1], 1 }

</bundles_post_ra>
